<compile_context>
chip_gen: v5e
topology: v5e:2x2
jax: 0.10.0
libtpu: 0.0.40
codegen_flags: <defaults>
</compile_context>

<pallas_src>
import jax
import jax.numpy as jnp
from jax.experimental import pallas as pl
from jax.experimental.pallas import tpu as pltpu


# --------------------------------------------------------------------------- #
# Pallas kernel: fused BN(affine) + ReLU + 1x1 conv over a (Bb, C, TM) tile.
# --------------------------------------------------------------------------- #
def output_stack_kernel(x_ref, scale_ref, shift_ref, w_ref, b_ref, o_ref):
    # x_ref:     (Bb, C, TM)     raw NCHW pixels (C on sublanes, pixels on lanes)
    # scale_ref: (C, 1)          folded BN scale   gamma / sqrt(running_var + eps)
    # shift_ref: (C, 1)          folded BN shift   beta - running_mean * scale
    # w_ref:     (Cout, C)       spectrally-normalised 1x1 conv weight
    # b_ref:     (Cout, 1)       conv bias
    # o_ref:     (Bb, Cout, TM)  conv output, lane-dense
    bb = x_ref.shape[0]                                             # static
    x = x_ref[...].astype(jnp.float32)                              # (Bb, C, TM)
    h = jnp.maximum(x * scale_ref[...] + shift_ref[...], 0.0)       # BN + ReLU (VPU)

    if bb == 1:
        # Proven 2-D path: single MXU matmul over all pixels of the tile.
        y = jnp.dot(w_ref[...], h[0],
                    preferred_element_type=jnp.float32) + b_ref[...]     # (Cout, TM)
        o_ref[...] = y[None].astype(o_ref.dtype)
    else:
        # Batch-blocked path for small images: canonical batched matmul
        # (Bb, Cout, C) @ (Bb, C, TM) -> (Bb, Cout, TM) on the MXU.
        w_b = jnp.broadcast_to(w_ref[...], (bb,) + w_ref.shape)          # (Bb, Cout, C)
        y = jnp.einsum("boc,bct->bot", w_b, h,
                       preferred_element_type=jnp.float32) + b_ref[...]
        o_ref[...] = y.astype(o_ref.dtype)


# --------------------------------------------------------------------------- #
# Small helpers (plain JAX: layout plumbing + tiny matvec math).
# --------------------------------------------------------------------------- #
def _l2normalize(v, eps=1e-12):
    return v / (jnp.linalg.norm(v) + eps)


def _spectral_normalize(w_bar, u, v, power_iterations=1):
    """Mirror SpectralNorm._update_u_v for a (Cout, Cin) 1x1 conv weight."""
    w = w_bar.reshape(w_bar.shape[0], -1)
    for _ in range(power_iterations):
        v = _l2normalize(w.T @ u)
        u = _l2normalize(w @ v)
    sigma = u @ (w @ v)
    return w_bar / sigma


def _depth_to_space_nchw(x, s):
    """Identical index mapping to the PyTorch depth_to_space helper."""
    B, C, H, W = x.shape
    nc = C // (s * s)
    x = x.reshape(B, nc, s, s, H, W)
    x = jnp.transpose(x, (0, 1, 4, 2, 5, 3))
    return x.reshape(B, nc, H * s, W * s)


def _divisors_desc(n):
    small, large = [], []
    i = 1
    while i * i <= n:
        if n % i == 0:
            small.append(i)
            if i != n // i:
                large.append(n // i)
        i += 1
    return sorted(small + large, reverse=True)


def _choose_tiling(B, C, n_pix, *, itemsize=4,
                   target_bytes=2 << 20, cap_bytes=6 << 20,
                   max_batch_block=16, min_steps=4):
    """Pick (batch_block, pixel_tile) so each grid step moves ~2-6 MiB of input."""
    px_bytes = C * itemsize                     # input bytes per pixel
    img_bytes = n_pix * px_bytes

    if img_bytes >= target_bytes or n_pix % 128 != 0:
        bb = 1
        if n_pix % 128 == 0:
            cap_tm = max(128, cap_bytes // px_bytes)
            cands = [d for d in _divisors_desc(n_pix)
                     if d % 128 == 0 and d <= cap_tm]
            tm = cands[0] if cands else n_pix
        else:
            # Non-128-divisible pixel count: full-extent block is always legal.
            # TODO(synk): pad the pixel axis instead for huge odd-sized images.
            tm = n_pix
    else:
        # Small image: take the whole image per step and block over the batch.
        tm = n_pix
        want = max(1, target_bytes // max(img_bytes, 1))
        bb = max((d for d in _divisors_desc(B)
                  if d <= min(want, max_batch_block)), default=1)

    # Keep >= min_steps grid steps when possible (v7x: 2 TCs + pipelining).
    def steps(bb_, tm_):
        return (B // bb_) * (n_pix // tm_)

    while steps(bb, tm) < min_steps:
        if bb > 1:
            bb = max((d for d in _divisors_desc(B) if d < bb), default=1)
        elif tm > 128 and n_pix % 128 == 0:
            smaller = [d for d in _divisors_desc(n_pix)
                       if d % 128 == 0 and d < tm]
            if not smaller:
                break
            tm = smaller[0]
        else:
            break
    return bb, tm


# --------------------------------------------------------------------------- #
# Public forward (PyTorch call convention: NCHW in, NCHW out).
# --------------------------------------------------------------------------- #
def output_stack_forward(x_nchw, params, *, eps=1e-5, block_b=None, block_m=None):
    """x_nchw: (B, 48, H, W).  Returns (B, 1, 2H, 2W) float32."""
    gamma, beta, running_mean, running_var, w_bar, bias, u, v = params
    B, C, H, W = x_nchw.shape
    Cout = w_bar.shape[0]
    n_pix = H * W

    # Fold eval-mode BatchNorm into a per-channel affine (scale, shift).
    scale = gamma / jnp.sqrt(running_var + eps)
    shift = beta - running_mean * scale

    # Spectral norm: one power iteration on the tiny (Cout, C) matrix, in plain JAX.
    w_eff = _spectral_normalize(w_bar, u, v, power_iterations=1)

    bb, tm = _choose_tiling(B, C, n_pix, itemsize=x_nchw.dtype.itemsize)
    if block_b is not None:
        bb = block_b
    if block_m is not None:
        tm = block_m
    assert B % bb == 0 and n_pix % tm == 0, (B, bb, n_pix, tm)

    x_flat = x_nchw.reshape(B, C, n_pix)          # native NCHW, no transpose needed

    # VMEM budget: double-buffered input + output blocks (+ headroom); covers v5e's
    # 16 MiB scoped default when the largest tiles are selected.
    itemsize = 4
    in_block_bytes = bb * C * tm * itemsize
    out_block_bytes = bb * max(Cout, 8) * tm * itemsize
    vmem_need = 2 * (in_block_bytes + out_block_bytes) + (4 << 20)
    vmem_limit = int(min(48 << 20, max(vmem_need, 32 << 20)))

    flops = 2 * C * Cout * B * n_pix + 3 * B * C * n_pix
    bytes_accessed = (B * C * n_pix + B * Cout * n_pix) * itemsize

    y_flat = pl.pallas_call(
        output_stack_kernel,
        out_shape=jax.ShapeDtypeStruct((B, Cout, n_pix), jnp.float32),
        grid=(B // bb, n_pix // tm),
        in_specs=[
            pl.BlockSpec((bb, C, tm), lambda i, j: (i, 0, j)),   # pixels, lane-dense
            pl.BlockSpec((C, 1), lambda i, j: (0, 0)),           # BN scale
            pl.BlockSpec((C, 1), lambda i, j: (0, 0)),           # BN shift
            pl.BlockSpec((Cout, C), lambda i, j: (0, 0)),        # conv weight
            pl.BlockSpec((Cout, 1), lambda i, j: (0, 0)),        # conv bias
        ],
        out_specs=pl.BlockSpec((bb, Cout, tm), lambda i, j: (i, 0, j)),
        compiler_params=pltpu.CompilerParams(
            dimension_semantics=("parallel", "parallel"),
            vmem_limit_bytes=vmem_limit),
        cost_estimate=pl.CostEstimate(
            flops=flops, transcendentals=0, bytes_accessed=bytes_accessed),
    )(
        x_flat,
        scale.reshape(C, 1).astype(jnp.float32),
        shift.reshape(C, 1).astype(jnp.float32),
        w_eff.astype(jnp.float32),
        bias.reshape(Cout, 1).astype(jnp.float32),
    )

    # depth_to_space on the small (B, 4, H, W) output: pure layout shuffle in XLA.
    y = y_flat.reshape(B, Cout, H, W)
    return _depth_to_space_nchw(y, 2)


# --------------------------------------------------------------------------- #
# Pure-JAX reference matching the PyTorch forward (eval-mode BN).
# --------------------------------------------------------------------------- #
def output_stack_reference(x_nchw, params, eps=1e-5):
    gamma, beta, running_mean, running_var, w_bar, bias, u, v = params
    xf = x_nchw.astype(jnp.float32)
    xb = (xf - running_mean.reshape(1, -1, 1, 1)) / jnp.sqrt(
        running_var.reshape(1, -1, 1, 1) + eps)
    xb = xb * gamma.reshape(1, -1, 1, 1) + beta.reshape(1, -1, 1, 1)
    xr = jax.nn.relu(xb)
    w_eff = _spectral_normalize(w_bar, u, v, power_iterations=1)
    y = jnp.einsum("bchw,oc->bohw", xr, w_eff,
                   precision=jax.lax.Precision.HIGHEST) + bias.reshape(1, -1, 1, 1)
    return _depth_to_space_nchw(y, 2)


if __name__ == "__main__":
    # Channels are fixed at 48 by the module (BatchNorm2d(48), Conv2d(48, 4, 1)).
    B, C, Cout, H, W = 2, 48, 4, 16, 16

    key = jax.random.PRNGKey(0)
    ks = jax.random.split(key, 9)
    gamma = 1.0 + 0.1 * jax.random.normal(ks[0], (C,), jnp.float32)
    beta = 0.1 * jax.random.normal(ks[1], (C,), jnp.float32)
    running_mean = 0.1 * jax.random.normal(ks[2], (C,), jnp.float32)
    running_var = jnp.abs(1.0 + 0.1 * jax.random.normal(ks[3], (C,), jnp.float32))
    w_bar = 0.1 * jax.random.normal(ks[4], (Cout, C), jnp.float32)   # 1x1 conv weight
    bias = 0.1 * jax.random.normal(ks[5], (Cout,), jnp.float32)
    u = _l2normalize(jax.random.normal(ks[6], (Cout,), jnp.float32))
    v = _l2normalize(jax.random.normal(ks[7], (C,), jnp.float32))
    params = (gamma, beta, running_mean, running_var, w_bar, bias, u, v)

    x = jax.random.normal(ks[8], (B, C, H, W), jnp.float32)          # NCHW input

    ref = jax.block_until_ready(output_stack_reference(x, params))

    # Default (auto-tiled) path.
    out = jax.block_until_ready(output_stack_forward(x, params))
    assert out.shape == (B, 1, 2 * H, 2 * W), out.shape
    max_err = float(jnp.max(jnp.abs(out - ref)))
    assert max_err < 3e-4, max_err

    # Also exercise the batch-blocked (Bb > 1) path used for small images.
    out_bb = jax.block_until_ready(
        output_stack_forward(x, params, block_b=2, block_m=H * W))
    max_err_bb = float(jnp.max(jnp.abs(out_bb - ref)))
    assert max_err_bb < 3e-4, max_err_bb

    print("KERNEL_OK")
</pallas_src>

<mosaic_0001>
module attributes {stable_mosaic.version = 11 : i64} {
  func.func @output_stack_kernel(%arg0: i32, %arg1: i32, %arg2: memref<1x48x128xf32, #tpu.memory_space<vmem>>, %arg3: memref<48x1xf32, #tpu.memory_space<vmem>>, %arg4: memref<48x1xf32, #tpu.memory_space<vmem>>, %arg5: memref<4x48xf32, #tpu.memory_space<vmem>>, %arg6: memref<4x1xf32, #tpu.memory_space<vmem>>, %arg7: memref<1x4x128xf32, #tpu.memory_space<vmem>>) attributes {dimension_semantics = [#tpu.dimension_semantics<parallel>, #tpu.dimension_semantics<parallel>], iteration_bounds = array<i64: 2, 2>, scalar_prefetch = 0 : i64, scratch_operands = 0 : i64, tpu.core_type = #tpu.core_type<tc>, window_params = [{transform_indices = @transform_0, window_bounds = array<i64: 1, 48, 128>}, {pipeline_mode = #tpu.pipeline_mode<synchronous>, transform_indices = @transform_1, window_bounds = array<i64: 48, 1>}, {pipeline_mode = #tpu.pipeline_mode<synchronous>, transform_indices = @transform_2, window_bounds = array<i64: 48, 1>}, {pipeline_mode = #tpu.pipeline_mode<synchronous>, transform_indices = @transform_3, window_bounds = array<i64: 4, 48>}, {pipeline_mode = #tpu.pipeline_mode<synchronous>, transform_indices = @transform_4, window_bounds = array<i64: 4, 1>}, {transform_indices = @transform_5, window_bounds = array<i64: 1, 4, 128>}]} {
    %c0 = arith.constant 0 : index
    %c0_0 = arith.constant 0 : index
    %c0_1 = arith.constant 0 : index
    %0 = vector.load %arg2[%c0, %c0_0, %c0_1] : memref<1x48x128xf32, #tpu.memory_space<vmem>>, vector<1x48x128xf32>
    %c0_2 = arith.constant 0 : index
    %c0_3 = arith.constant 0 : index
    %1 = vector.load %arg3[%c0_2, %c0_3] : memref<48x1xf32, #tpu.memory_space<vmem>>, vector<48x1xf32>
    %2 = vector.shape_cast %1 : vector<48x1xf32> to vector<1x48x1xf32>
    %3 = vector.broadcast %2 : vector<1x48x1xf32> to vector<1x48x128xf32>
    %4 = arith.mulf %0, %3 : vector<1x48x128xf32>
    %c0_4 = arith.constant 0 : index
    %c0_5 = arith.constant 0 : index
    %5 = vector.load %arg4[%c0_4, %c0_5] : memref<48x1xf32, #tpu.memory_space<vmem>>, vector<48x1xf32>
    %6 = vector.shape_cast %5 : vector<48x1xf32> to vector<1x48x1xf32>
    %7 = vector.broadcast %6 : vector<1x48x1xf32> to vector<1x48x128xf32>
    %8 = arith.addf %4, %7 : vector<1x48x128xf32>
    %cst = arith.constant 0.000000e+00 : f32
    %9 = vector.broadcast %cst : f32 to vector<1x48x128xf32>
    %10 = arith.maximumf %8, %9 : vector<1x48x128xf32>
    %c0_6 = arith.constant 0 : index
    %c0_7 = arith.constant 0 : index
    %11 = vector.load %arg5[%c0_6, %c0_7] : memref<4x48xf32, #tpu.memory_space<vmem>>, vector<4x48xf32>
    %12 = vector.shape_cast %10 : vector<1x48x128xf32> to vector<48x128xf32>
    %cst_8 = arith.constant dense<0.000000e+00> : vector<4x128xf32>
    %13 = tpu.matmul %11, %12, %cst_8 {dimension_numbers = #tpu.dot_dimension_numbers<[1], [0], [0], [1], [0, 0, 1, 1], [], []>} : vector<4x48xf32>, vector<48x128xf32>, vector<4x128xf32> -> vector<4x128xf32>
    %c0_9 = arith.constant 0 : index
    %c0_10 = arith.constant 0 : index
    %14 = vector.load %arg6[%c0_9, %c0_10] : memref<4x1xf32, #tpu.memory_space<vmem>>, vector<4x1xf32>
    %15 = vector.broadcast %14 : vector<4x1xf32> to vector<4x128xf32>
    %16 = arith.addf %13, %15 : vector<4x128xf32>
    %17 = vector.shape_cast %16 : vector<4x128xf32> to vector<1x4x128xf32>
    %c0_11 = arith.constant 0 : index
    %c0_12 = arith.constant 0 : index
    %c0_13 = arith.constant 0 : index
    %18 = vector.load %arg7[%c0_11, %c0_12, %c0_13] : memref<1x4x128xf32, #tpu.memory_space<vmem>>, vector<1x4x128xf32>
    tpu.vector_store %arg7[%c0_11, %c0_12, %c0_13], %17 {strides = array<i32>} : memref<1x4x128xf32, #tpu.memory_space<vmem>>, vector<1x4x128xf32>,
    return
  }
  func.func @transform_0(%arg0: i32, %arg1: i32) -> (i32, i32, i32) {
    %c0_i32 = arith.constant 0 : i32
    %c0_i32_0 = arith.constant 0 : i32
    return %arg0, %c0_i32, %arg1 : i32, i32, i32
  }
  func.func @transform_1(%arg0: i32, %arg1: i32) -> (i32, i32) {
    %c0_i32 = arith.constant 0 : i32
    %c0_i32_0 = arith.constant 0 : i32
    %c0_i32_1 = arith.constant 0 : i32
    return %c0_i32, %c0_i32_0 : i32, i32
  }
  func.func @transform_2(%arg0: i32, %arg1: i32) -> (i32, i32) {
    %c0_i32 = arith.constant 0 : i32
    %c0_i32_0 = arith.constant 0 : i32
    %c0_i32_1 = arith.constant 0 : i32
    return %c0_i32, %c0_i32_0 : i32, i32
  }
  func.func @transform_3(%arg0: i32, %arg1: i32) -> (i32, i32) {
    %c0_i32 = arith.constant 0 : i32
    %c0_i32_0 = arith.constant 0 : i32
    %c0_i32_1 = arith.constant 0 : i32
    return %c0_i32, %c0_i32_0 : i32, i32
  }
  func.func @transform_4(%arg0: i32, %arg1: i32) -> (i32, i32) {
    %c0_i32 = arith.constant 0 : i32
    %c0_i32_0 = arith.constant 0 : i32
    %c0_i32_1 = arith.constant 0 : i32
    return %c0_i32, %c0_i32_0 : i32, i32
  }
  func.func @transform_5(%arg0: i32, %arg1: i32) -> (i32, i32, i32) {
    %c0_i32 = arith.constant 0 : i32
    %c0_i32_0 = arith.constant 0 : i32
    return %arg0, %c0_i32, %arg1 : i32, i32, i32
  }
}

</mosaic_0001>

<bundles_post_ra>
// kernel: tpu_custom_call.1
= control target key start
LH: loop header
LB: loop body
LE: loop exit
PB: predicated region body
PF: predicated region fallthrough
CT: control target
= control target key end

     0   :  { %10 = vsyncpa [#allocation3], 0  ;;  %s951_s0 = inlined_call_operand.hbm [shape: f32[2,48,256], index: 0, kind: input, shape index: {}]   ;;  %s952_s1 = inlined_call_operand.vmem [shape: f32[48,1], index: 1, kind: input, shape index: {}]   ;;  %s953_s2 = inlined_call_operand.vmem [shape: f32[48,1], index: 2, kind: input, shape index: {}]   ;;  %s954_s3 = inlined_call_operand.vmem [shape: f32[4,48], index: 3, kind: input, shape index: {}]   ;;  %s955_s4 = inlined_call_operand.vmem [shape: f32[4,1], index: 4, kind: input, shape index: {}]   ;;  %s956_s5 = inlined_call_operand.hbm [shape: f32[2,4,256], index: 5, kind: output, shape index: {}]  }
   0x1   :  { %12 = vsyncpa [#allocation3 + $0x1], 0 }
   0x2   :  { %13 = vsyncpa [#allocation4], 0 }
   0x3   :  { %15 = vsyncpa [#allocation4 + $0x1], 0  ;;  %s758_s18 = smov 0   ;;  %s760_s19 = smov 0  }
   0x4   :  { %s762_s20 = smov 0   ;;  %s764_s21 = smov 0  }
   0x5   :  { %s766_s22 = smov 0   ;;  %s768_s23 = smov 0  }
   0x6   :  { %s770_s24 = smov 0   ;;  %s772_s25 = smov 0  }
   0x7 LB: > { %961 = sst [smem:[#allocation8_spill]] %s702_s20  ;;  %s493_s26 = sadd.s32 4294967295, %s722_s25   ;;  %s722_s25 = sphi %s772_s25, %s21_s25   ;;  %s718_s24 = sphi %s770_s24, %s980_s24   ;;  %s714_s23 = sphi %s768_s23, %s979_s23   ;;  %s710_s22 = sphi %s766_s22, %s978_s22   ;;  %s706_s21 = sphi %s764_s21, %s977_s21   ;;  %s702_s20 = sphi %s762_s20, %s972_s20   ;;  %s698_s19 = sphi %s760_s19, %s976_s19   ;;  %s694_s18 = sphi %s758_s18, %s975_s18  }
   0x8   : > { %s494_s27 = sadd.s32 4294967294, %s722_s25   ;;  %s30_s28 = sadd.s32 1, %s714_s23 }
   0x9   : > { %s33_s29 = sadd.s32 1, %s718_s24  ;;  %p31_p0 = scmp.ge.s32.totalorder %s30_s28, 2 }
   0xa   : > { %s42_s30 = sadd.s32 1, %s702_s20  ;;  %p49_p1 = scmp.ne.s32.totalorder %s702_s20, %s698_s19 }
   0xb   : > { %p50_p2 = scmp.eq.s32.totalorder %s722_s25, 0  ;;  %s982_s28 = smov (%p31_p0, %s30_s28), 0 }
   0xc   : > { %962 = sst [smem:[#allocation9_spill]] %s982_s28  ;;  %s984_s29 = smov (!%p31_p0, %s33_s29), %s718_s24 }
   0xd   : > { %s38_s6 = ssub.s32 %s714_s23, %s982_s28  ;;  %p811_p3 = por %p50_p2, %p49_p1 }
   0xe   : > { %p35_p4 = scmp.ge.s32.totalorder %s984_s29, 2  ;;  %p55_p5 = scmp.ne.s32.totalorder %s698_s19, %s694_s18 }
   0xf   : > { %p56_p6 = scmp.eq.s32.totalorder %s493_s26, 0  ;;  %p165_p7 = scmp.eq.s32.totalorder %s493_s26, 3 }
  0x10   : > { %s986_s29 = smov (%p35_p4, %s984_s29), 0  ;;  %p171_p10 = scmp.eq.s32.totalorder %s494_s27, 3 }
  0x11   : > { %964 = sst [smem:[#allocation10_spill]] %s986_s29  ;;  %p819_p8 = por %p56_p6, %p55_p5 }
  0x12   : > { %p823_p9 = por %p165_p7, %p49_p1  ;;  %s37_s10 = ssub.s32 %s718_s24, %s986_s29 }
  0x13   : > { %s39_s11 = sor.u32 %s38_s6, %s37_s10  ;;  %p829_p12 = por %p171_p10, %p55_p5 }
  0x14   : > { %p40_p11 = scmp.eq.s32.totalorder %s39_s11, 0  ;;  %p521_p13 = scmp.lt.s32.totalorder %s722_s25, 4 }
  0x15   : > { %s967_s12 = scalar_select %p829_p12, 1, 0 }
  0x16   : > { %s203_s13 = sand.u32 1, %s702_s20   ;;  %s507_s16 = smul.u32 12, %s718_s24 }
  0x17   : > { %968 = sst [smem:[#allocation11_spill]] %s967_s12  ;;  %s506_s15 = smul.u32 48, %s203_s13 }
  0x18   : > { %s836_s14 = scalar_select %p40_p11, %s702_s20, %s42_s30  }
  0x19   : > { %p514_p0 = pnand %p521_p13, %p811_p3  ;;  %s211_s17 = sadd.s32 %s714_s23, %s507_s16 }
  0x1a   : > { %969 = sst [smem:[#allocation12_spill]] %s836_s14  ;;  %s207_s26 = scalar_lea.vmem [#allocation2], %s506_s15 }
  0x1b   : > { %s216_s29 = sshll.u32 %s207_s26, 4  ;;  %s497_s27 = sshll.u32 %s211_s17, 3  ;;  %s217_s29 = int_to_ptr.vmem [resolvable:$true] %s216_s29 }
  0x1c   : > { %s213_s11 = scalar_lea.hbm %s951_s0, %s497_s27  ;;  %s204_s12 = scalar_lea.sflag [#allocation3], %s203_s13 }
  0x1d   : > { %s214_s28 = sshll.u32 %s213_s11, 4  ;;  %s724_s30 = smov 256   ;;  %s215_s28 = int_to_ptr.hbm [resolvable:$true] %s214_s28 }
  0x1e   : > { %s725_s14 = smov 128   ;;  %s726_s20 = smov 8  }
  0x1f   : > { %516 = dma.hbm_to_vmem [thread:$0]  (!%p514_p0), %s215_s28, 768, %s217_s29, %s204_s12, %s724_s30, %s725_s14, %s726_s20  }
  0x20   : > { %p498_p1 = scmp.ge.s32.totalorder %s722_s25, 1  ;;  %p224_p2 = scmp.lt.s32.totalorder %s722_s25, 5 }
  0x22   : > { %p225_p4 = pnand %p498_p1, %p224_p2 }
  0x23   : > { %s848_s7 = sand.u32 (!%p225_p4), 1, %s698_s19  }
  0x24   : > { %228 = sbr.rel (%p225_p4) target bundleno = 322 (0x142), region = 40  ;;  %s231_s16 = scalar_lea.sflag (!%p225_p4), [#allocation3], %s848_s7 }
  0x25   : > { %s508_s15 = smul.u32 (!%p225_p4), 48, %s848_s7 }
  0x27   : > { %s852_s17 = scalar_lea.vmem (!%p225_p4), [#allocation2], %s508_s15 }
  0x29   : > { %685 = dma.done.wait (%p819_p8), %s231_s16, 768  }
  0x2a   : > { %687 = vsyncadd (%p819_p8), %s231_s16, 4294966528  ;;  %v727_v0 = vmov 0   ;;  %v315_v1 = vld [vmem:[%s953_s2 + $0x28] sm:$0xff]  ;;  %v314_v3 = vld [vmem:[%s953_s2 + $0x20] sm:$0xff]  ;;  %vm365_vm0 = vcmask 392192   ;;  %s499_s16 = sshll.u32 %s848_s7, 2 }
  0x2b   : > { %592 = vset.pattern.permute.xlu1 %v727_v0  ;;  %591 = vset.pattern.permute.xlu0 %v727_v0  ;;  %v273_v2 = vld [vmem:[%s952_s1 + $0x28] sm:$0xff]  ;;  %v272_v4 = vld [vmem:[%s952_s1 + $0x20] sm:$0xff]  ;;  %v271_v5 = vld [vmem:[%s952_s1 + $0x18] sm:$0xff]  ;;  %s261_s13 = scalar_lea.vmem [#allocation5], %s499_s16  ;;  %s391_s26 = scalar_lea.sflag [#allocation4], %s848_s7 }
  0x2c   : > { %593 = vset.pattern.permute.xlu2 %v727_v0  ;;  %343 = vperm.xlu1 %592, %v315_v1   ;;  %v270_v6 = vld [vmem:[%s952_s1 + $0x10] sm:$0xff]  ;;  %v313_v7 = vld [vmem:[%s953_s2 + $0x18] sm:$0xff]  ;;  %v269_v8 = vld [vmem:[%s952_s1 + $0x8] sm:$0xff]  ;;  %s405_s14 = sshll.u32 %s261_s13, 4  ;;  %s644_s10 = scalar_lea.hbm %s956_s5, 16  ;;  %s406_s14 = int_to_ptr.vmem [resolvable:$true] %s405_s14 }
  0x2d   : > { %301 = vperm.xlu0 %591, %v273_v2   ;;  %338 = vperm.xlu2 %593, %v314_v3   ;;  %v312_v9 = vld [vmem:[%s953_s2 + $0x10] sm:$0xff]  ;;  %v311_v10 = vld [vmem:[%s953_s2 + $0x8] sm:$0xff]  ;;  %v268_v11 = vld [vmem:[%s952_s1] sm:$0xff] }
  0x2e   : > { %v310_v12 = vld [vmem:[%s953_s2] sm:$0xff]  ;;  %v267_v15 = vld [vmem:[%s852_s17 + $0x28] sm:$0xff]  ;;  %v265_v28 = vld [vmem:[%s852_s17 + $0x18] sm:$0xff] }
  0x2f   : > { %v359_v13 = vld [vmem:[%s955_s4] sm:$0xf]  ;;  %v263_v38 = vld [vmem:[%s852_s17 + $0x8] sm:$0xff] }
  0x30   : > { %v266_v22 = vld [vmem:[%s852_s17 + $0x20] sm:$0xff]  ;;  %v264_v26 = vld [vmem:[%s852_s17 + $0x10] sm:$0xff] }
  0x31   : > { %v262_v40 = vld [vmem:[%s852_s17] sm:$0xff]  ;;  %s502_s17 = sshll.u32 %s710_s22, 1 }
  0x32   : > { %v358_v50 = vld [vmem:[%s954_s3] sm:$0xf]  ;;  %s401_s15 = sadd.s32 %s706_s21, %s502_s17 }
  0x33   : > { %s503_s20 = sshll.u32 %s401_s15, 2 }
  0x34   : > { %291 = vperm.xlu1 %592, %v271_v5   ;;  %s403_s12 = scalar_lea.hbm %s956_s5, %s503_s20 }
  0x35   : > { %296 = vperm.xlu0 %591, %v272_v4   ;;  %286 = vperm.xlu2 %593, %v270_v6   ;;  %s407_s8 = sshll.u32 %s403_s12, 4  ;;  %s408_s8 = int_to_ptr.hbm [resolvable:$true] %s407_s8 }
  0x36   : > { %s638_s27 = sshra.s32 %s408_s8, 4  ;;  %s639_s27 = int_to_ptr.hbm [resolvable:$true] %s638_s27 }
  0x37   : > { %s640_s21 = scalar_lea.hbm %s639_s27, 4  ;;  %p645_p7 = scmp.lt.s32.totalorder %s639_s27, %s956_s5 }
  0x38   : > { %p641_p3 = scmp.ne.s32.totalorder %s639_s27, %s640_s21  ;;  %p646_p8 = scmp.lt.s32.totalorder %s644_s10, %s640_s21 }
  0x3a   : > { %p642_p5 = pnand %p641_p3, %p823_p9  ;;  %p647_p10 = por %p646_p8, %p645_p7 }
  0x3c   : > { %281 = vperm.xlu1 %592, %v269_v8   ;;  %p643_p6 = pneg %p642_p5 }
  0x3d   : > { %333 = vperm.xlu0 %591, %v313_v7   ;;  %328 = vperm.xlu2 %593, %v312_v9  }
  0x3e   : > { %p648_p11 = pnand %p647_p10, %p643_p6 }
  0x44   : > { %323 = vperm.xlu1 %592, %v311_v10  }
  0x45   : > { %276 = vperm.xlu0 %591, %v268_v11   ;;  %318 = vperm.xlu2 %593, %v310_v12  }
  0x4d   : > { %362 = vperm.xlu0 %591, %v359_v13  }
  0x87   : > { %v339_v14 = vpop.permute.xlu2 %338 }
  0x8f   : > { %v287_v20 = vpop.permute.xlu2 %286 }
  0x90   : > { %v306_v29 = vmul.f32 %v287_v20, %v264_v26 }
  0x97   : > { %v329_v31 = vpop.permute.xlu2 %328 }
  0x98   : > { %v348_v35 = vadd.f32 %v329_v31, %v306_v29 }
  0x9a   : > { %v354_v39 = vmax.f32 %v348_v35, 0.0 }
  0x9e   : > { %v344_v16 = vpop.permute.xlu1 %343 }
  0x9f   : > { %v302_v17 = vpop.permute.xlu0 %301  ;;  %v319_v46 = vpop.permute.xlu2 %318 }
  0xa0   : > { %v309_v18 = vmul.f32 %v302_v17, %v267_v15 }
  0xa2   : > { %v351_v19 = vadd.f32 %v344_v16, %v309_v18 }
  0xa4   : > { %v357_v21 = vmax.f32 %v351_v19, 0.0 }
  0xa6   : > { %379 = vmatpush.msra.mxu0 %v357_v21  ;;  %v292_v24 = vpop.permute.xlu1 %291 }
  0xa7   : > { %v297_v23 = vpop.permute.xlu0 %296  ;;  %v307_v32 = vmul.f32 %v292_v24, %v265_v28 }
  0xa8   : > { %v308_v25 = vmul.f32 %v297_v23, %v266_v22 }
  0xaa   : > { %v350_v27 = vadd.f32 %v339_v14, %v308_v25 }
  0xac   : > { %v356_v30 = vmax.f32 %v350_v27, 0.0 }
  0xae   : > { %380 = vmatpush.msra.mxu0 %v356_v30  ;;  %v282_v34 = vpop.permute.xlu1 %281 }
  0xaf   : > { %v334_v33 = vpop.permute.xlu0 %333  ;;  %v305_v41 = vmul.f32 %v282_v34, %v263_v38 }
  0xb0   : > { %v349_v36 = vadd.f32 %v334_v33, %v307_v32 }
  0xb2   : > { %v355_v37 = vmax.f32 %v349_v36, 0.0 }
  0xb4   : > { %381 = vmatpush.msra.mxu0 %v355_v37 }
  0xb6   : > { %382 = vmatpush.msra.mxu0 %v354_v39  ;;  %v324_v42 = vpop.permute.xlu1 %323 }
  0xb7   : > { %v277_v43 = vpop.permute.xlu0 %276  ;;  %v347_v44 = vadd.f32 %v324_v42, %v305_v41 }
  0xb8   : > { %v304_v45 = vmul.f32 %v277_v43, %v262_v40 }
  0xb9   : > { %v353_v47 = vmax.f32 %v347_v44, 0.0 }
  0xba   : > { %v346_v48 = vadd.f32 %v319_v46, %v304_v45 }
  0xbb   : > { %383 = vmatpush.msra.mxu0 %v353_v47 }
  0xbc   : > { %v352_v49 = vmax.f32 %v346_v48, 0.0 }
  0xbe   : > { %384 = vmatpush.msra.mxu0 %v352_v49 }
  0xbf   : > { %500 = vmatmul.msk.f32.vlgmr.msra.gmra.mxu0 %vm365_vm0, %v358_v50  ;;  %v363_v51 = vpop.permute.xlu0 %362 }
 0x13c   : > { %v386_v52 = vpop.f32.mrf.mxu0 }
 0x13d   : > { %v387_v53 = vadd.f32 %v386_v52, %v363_v51 }
 0x13f   : > { %389 = vst [vmem:[%s261_s13] sm:$0xf] %v387_v53 }
 0x140   : > { %651 = shalt.err (!%p648_p11)
}
 0x141   : > { %511 = dma.vmem_to_hbm [thread:$0]  (%p823_p9), %s406_s14, 64, %s408_s8, %s391_s26  }
 0x142 PF: > { %p522_p13 = scmp.ge.s32.totalorder %s722_s25, 2  ;;  %s419_s17 = sand.u32 1, %s694_s18  }
 0x143   : > { %s420_s15 = scalar_lea.sflag [#allocation4], %s419_s17 }
 0x144   : > { %p518_p0 = pnand %p522_p13, %p829_p12 }
 0x146   : > { %p519_p1 = pneg %p518_p0 }
 0x148   : > { %689 = dma.done.wait (%p519_p1), %s420_s15, 64  }
 0x149   : > { %691 = vsyncadd (%p519_p1), %s420_s15, 4294967232  ;;  %s21_s25 = sadd.s32 1, %s722_s25   ;;  %s971_s16 = sld [smem:[#allocation8_spill]] }
 0x14a   : > { %p18_p2 = scmp.ge.s32.totalorder %s21_s25, 6   ;;  %s972_s20 = sld [smem:[#allocation12_spill]] }
 0x14b   : > { %s973_s9 = sld [smem:[#allocation9_spill]]  ;;  %s975_s18 = smov %s698_s19 }
 0x14c   : > { %s974_s28 = sld [smem:[#allocation10_spill]]  ;;  %s977_s21 = smov %s714_s23 }
 0x14d   : > { %s978_s22 = smov %s718_s24 }
 0x14e   :  { %20 = sbr.rel (!%p18_p2) target bundleno = 7 (0x7), region = 85 }
 0x14f   : > { %s976_s19 = smov %s971_s16 }
 0x151   : > { %s979_s23 = smov %s973_s9 }
 0x152   : > { %s980_s24 = smov %s974_s28 }
 0x153   :  { %426 = vsyncpa [#allocation3], 1 }
 0x154   :  { %428 = vsyncpa [#allocation3 + $0x1], 1 }
 0x155   :  { %429 = vsyncpa [#allocation4], 1 }
 0x156   :  { %431 = vsyncpa [#allocation4 + $0x1], 1 }

</bundles_post_ra>
